<compile_context>
chip_gen: v6e
topology: v6e:2x2x1
jax: 0.10.0
libtpu: 0.0.40
codegen_flags: <defaults>
</compile_context>

<pallas_src>
import jax
import jax.numpy as jnp
from jax.experimental import pallas as pl
from jax.experimental.pallas import tpu as pltpu

_N_LANE = 512                 # lane-dense width (multiple of 128)
_TARGET_BLOCK_BYTES = 4 << 20  # ~4 MiB per buffer; x2 bufs x in/out = 16 MiB


def _sigmoid_affine_kernel(params_ref, x_ref, o_ref):
    # params_ref lives in SMEM: [w1, w2]. x/o are VMEM tiles.
    w1 = params_ref[0]
    w2 = params_ref[1]
    o_ref[...] = jax.nn.sigmoid(x_ref[...] * w1 + w2).astype(o_ref.dtype)


def _sigmoid_affine_elementwise(x: jax.Array, params: jax.Array) -> jax.Array:
    """sigmoid(x*w1+w2) elementwise, via a lane-dense (rows, 512) view."""
    orig_shape = x.shape
    total = x.size
    itemsize = jnp.dtype(x.dtype).itemsize

    rows = pl.cdiv(total, _N_LANE)
    max_rows = max(8, (_TARGET_BLOCK_BYTES // (_N_LANE * itemsize)) // 8 * 8)
    if rows <= max_rows:
        tile_rows = rows          # block == full dim -> always a legal tiling
    else:
        tile_rows = max_rows      # multiple of 8
    padded_rows = pl.cdiv(rows, tile_rows) * tile_rows
    padded_total = padded_rows * _N_LANE

    flat = x.reshape(-1)
    if padded_total != total:
        flat = jnp.pad(flat, (0, padded_total - total))
    x2d = flat.reshape(padded_rows, _N_LANE)

    out2d = pl.pallas_call(
        _sigmoid_affine_kernel,
        out_shape=jax.ShapeDtypeStruct((padded_rows, _N_LANE), x.dtype),
        grid_spec=pltpu.PrefetchScalarGridSpec(
            num_scalar_prefetch=0,
            grid=(padded_rows // tile_rows,),
            in_specs=[
                pl.BlockSpec(memory_space=pltpu.SMEM),              # params (2,)
                pl.BlockSpec((tile_rows, _N_LANE), lambda i: (i, 0)),
            ],
            out_specs=pl.BlockSpec((tile_rows, _N_LANE), lambda i: (i, 0)),
        ),
        compiler_params=pltpu.CompilerParams(
            dimension_semantics=("parallel",)
        ),
    )(params, x2d)

    out = out2d.reshape(-1)
    if padded_total != total:
        out = out[:total]
    return out.reshape(orig_shape)


def _sigmoid_last_timestep(x2: jax.Array, params: jax.Array,
                           num_steps: int, step_size: int) -> jax.Array:
    """Select the last timestep via index_map and apply sigmoid(x*w1+w2).

    x2 is a free (no-copy) reshape of the input to (B*C, T*S); the input
    BlockSpec picks block column T-1 (elements [(T-1)*S, T*S) per row), so the
    slice never touches HBM separately.
    """
    bc = x2.shape[0]
    itemsize = jnp.dtype(x2.dtype).itemsize
    bytes_per_row = step_size * itemsize
    target_rows = max(8, (_TARGET_BLOCK_BYTES // bytes_per_row) // 8 * 8)
    if bc <= target_rows:
        tile_bc = bc              # equal to full dim -> legal for any bc
    else:
        tile_bc = target_rows     # multiple of 8; edge block writes are masked
    grid_rows = pl.cdiv(bc, tile_bc)

    return pl.pallas_call(
        _sigmoid_affine_kernel,
        out_shape=jax.ShapeDtypeStruct((bc, step_size), x2.dtype),
        grid_spec=pltpu.PrefetchScalarGridSpec(
            num_scalar_prefetch=0,
            grid=(grid_rows,),
            in_specs=[
                pl.BlockSpec(memory_space=pltpu.SMEM),              # params (2,)
                pl.BlockSpec((tile_bc, step_size),
                             lambda i: (i, num_steps - 1)),
            ],
            out_specs=pl.BlockSpec((tile_bc, step_size), lambda i: (i, 0)),
        ),
        compiler_params=pltpu.CompilerParams(
            dimension_semantics=("parallel",)
        ),
    )(params, x2)


class TestModelPallas:
    """Pallas/JAX port of poteka-pipeline TestModel (w1 = w2 = 1.0)."""

    def __init__(self, return_sequences: bool = False):
        self.return_sequences = return_sequences
        self.w1 = jnp.ones((1,), dtype=jnp.float32)
        self.w2 = jnp.ones((1,), dtype=jnp.float32)

    @property
    def params(self) -> jax.Array:
        return jnp.concatenate([self.w1, self.w2])     # (2,) SMEM scalars

    def __call__(self, x: jax.Array):
        params = self.params
        if self.return_sequences is True:
            return _sigmoid_affine_elementwise(x, params)

        if x.ndim == 5:
            b, c, t, h, w = x.shape
            s = h * w
            if s % 128 == 0 or t == 1:
                # fused slice: (B,C,T,H,W) -> (B*C, T*H*W), pick block col T-1
                out = _sigmoid_last_timestep(x.reshape(b * c, t * s),
                                             params, t, s)
            else:
                # S not lane-aligned: slice in XLA, then lane-dense kernel
                out = _sigmoid_affine_elementwise(x[:, :, -1, :, :], params)
            return out.reshape(b, c, 1, h, w)

        if x.ndim == 4:
            b, c, t, p = x.shape
            if p % 128 == 0 or t == 1:
                out = _sigmoid_last_timestep(x.reshape(b * c, t * p),
                                             params, t, p)
            else:
                out = _sigmoid_affine_elementwise(x[:, :, -1, :], params)
            return out.reshape(b, c, 1, p)

        # Matches PyTorch behaviour: other ranks fall through (return None).
        return None


if __name__ == "__main__":
    key = jax.random.PRNGKey(0)
    k5, k4, kseq = jax.random.split(key, 3)

    model = TestModelPallas(return_sequences=False)

    # 5D case: (batch=2, channels=4, time=3, height=16, width=16)
    x5 = jax.random.normal(k5, (2, 4, 3, 16, 16), dtype=jnp.float32)
    out5 = jax.block_until_ready(model(x5))
    ref5 = jax.nn.sigmoid(x5[:, :, -1, :, :] * 1.0 + 1.0).reshape(2, 4, 1, 16, 16)
    assert out5.shape == (2, 4, 1, 16, 16)
    assert jnp.allclose(out5, ref5, atol=1e-6)

    # 4D case: (batch=2, channels=4, time=3, ob_point_count=16)
    x4 = jax.random.normal(k4, (2, 4, 3, 16), dtype=jnp.float32)
    out4 = jax.block_until_ready(model(x4))
    ref4 = jax.nn.sigmoid(x4[:, :, -1, :] * 1.0 + 1.0).reshape(2, 4, 1, 16)
    assert out4.shape == (2, 4, 1, 16)
    assert jnp.allclose(out4, ref4, atol=1e-6)

    # return_sequences=True case: elementwise over the full tensor.
    model_seq = TestModelPallas(return_sequences=True)
    xs = jax.random.normal(kseq, (2, 4, 3, 16, 16), dtype=jnp.float32)
    outs = jax.block_until_ready(model_seq(xs))
    refs = jax.nn.sigmoid(xs * 1.0 + 1.0)
    assert outs.shape == xs.shape
    assert jnp.allclose(outs, refs, atol=1e-6)

    print("KERNEL_OK")
</pallas_src>

<mosaic_0001>
module attributes {stable_mosaic.version = 11 : i64} {
  func.func @_sigmoid_affine_kernel(%arg0: i32, %arg1: memref<2xf32, #tpu.memory_space<smem>>, %arg2: memref<8x256xf32, #tpu.memory_space<vmem>>, %arg3: memref<8x256xf32, #tpu.memory_space<vmem>>) attributes {dimension_semantics = [#tpu.dimension_semantics<parallel>], iteration_bounds = array<i64: 1>, scalar_prefetch = 0 : i64, scratch_operands = 0 : i64, tpu.core_type = #tpu.core_type<tc>, window_params = [{transform_indices = @transform_0, window_bounds = array<i64: 2>}, {transform_indices = @transform_1, window_bounds = array<i64: 8, 256>}, {transform_indices = @transform_2, window_bounds = array<i64: 8, 256>}]} {
    %c0 = arith.constant 0 : index
    %0 = memref.load %arg1[%c0] : memref<2xf32, #tpu.memory_space<smem>>
    %c1 = arith.constant 1 : index
    %1 = memref.load %arg1[%c1] : memref<2xf32, #tpu.memory_space<smem>>
    %c0_0 = arith.constant 0 : index
    %c0_1 = arith.constant 0 : index
    %2 = vector.load %arg2[%c0_0, %c0_1] : memref<8x256xf32, #tpu.memory_space<vmem>>, vector<8x256xf32>
    %3 = vector.broadcast %0 : f32 to vector<8x256xf32>
    %4 = arith.mulf %2, %3 : vector<8x256xf32>
    %5 = vector.broadcast %1 : f32 to vector<8x256xf32>
    %6 = arith.addf %4, %5 : vector<8x256xf32>
    %7 = arith.negf %6 : vector<8x256xf32>
    %8 = math.exp %7 : vector<8x256xf32>
    %cst = arith.constant 1.000000e+00 : f32
    %9 = vector.broadcast %cst : f32 to vector<8x256xf32>
    %10 = arith.addf %9, %8 : vector<8x256xf32>
    %11 = arith.divf %9, %10 : vector<8x256xf32>
    %c0_2 = arith.constant 0 : index
    %c0_3 = arith.constant 0 : index
    %12 = vector.load %arg3[%c0_2, %c0_3] : memref<8x256xf32, #tpu.memory_space<vmem>>, vector<8x256xf32>
    tpu.vector_store %arg3[%c0_2, %c0_3], %11 {strides = array<i32>} : memref<8x256xf32, #tpu.memory_space<vmem>>, vector<8x256xf32>,
    return
  }
  func.func @transform_0(%arg0: i32) -> i32 {
    %c0_i32 = arith.constant 0 : i32
    %c0_i32_0 = arith.constant 0 : i32
    return %c0_i32 : i32
  }
  func.func @transform_1(%arg0: i32) -> (i32, i32) {
    %c2_i32 = arith.constant 2 : i32
    %c0_i32 = arith.constant 0 : i32
    return %arg0, %c2_i32 : i32, i32
  }
  func.func @transform_2(%arg0: i32) -> (i32, i32) {
    %c0_i32 = arith.constant 0 : i32
    %c0_i32_0 = arith.constant 0 : i32
    return %arg0, %c0_i32 : i32, i32
  }
}

</mosaic_0001>

<bundles_post_ra>
// kernel: tpu_custom_call.1
= control target key start
LH: loop header
LB: loop body
LE: loop exit
PB: predicated region body
PF: predicated region fallthrough
CT: control target
= control target key end

     0   :  { %7 = vsyncpa [#allocation5], 0  ;;  %s174_s0 = inlined_call_operand.hbm [shape: f32[2], index: 0, kind: input, shape index: {}]   ;;  %s175_s1 = inlined_call_operand.hbm [shape: f32[8,768], index: 1, kind: input, shape index: {}]   ;;  %s176_s2 = inlined_call_operand.hbm [shape: f32[8,256], index: 2, kind: output, shape index: {}]  }
   0x1   :  { %8 = vsyncpa [#allocation3], 0 }
   0x2   :  { %9 = vsyncpa [#allocation4], 0  ;;  %s147_s9 = smov [#allocation2]   ;;  %s23_s14 = scalar_lea.hbm %s175_s1, 512 }
   0x3   :  { %17 = dma.hbm_to_smem %s174_s0, 16, %s147_s9, [#allocation5]  }
   0x4   :  { %s148_s15 = smov [#allocation6]  }
   0x5   :  { %s25_s16 = sshll.u32 %s148_s15, 4  ;;  %s26_s16 = int_to_ptr.vmem [resolvable:$true] %s25_s16 }
   0x6   :  { %s108_s17 = scalar_lea.vmem %s26_s16, 256  ;;  %p113_p1 = scmp.lt.s32.totalorder %s26_s16, %s26_s16 }
   0x7   :  { %p109_p0 = scmp.ne.s32.totalorder %s26_s16, %s108_s17  ;;  %p114_p2 = scmp.lt.s32.totalorder %s108_s17, %s108_s17 }
   0x9   :  { %p115_p3 = por %p114_p2, %p113_p1 }
   0xb   :  { %p116_p4 = pnand %p115_p3, %p109_p0 }
   0xd   :  { %119 = shalt.err (!%p116_p4)
}
   0xe   :  { %28 = dma.hbm_to_vmem [thread:$0]  %s23_s14, 256, %s26_s16, [#allocation3]  }
   0xf   :  { %141 = dma.done.wait [#allocation5], 16  }
  0x10   :  { %142 = vsyncadd [#allocation5], 4294967280 }
  0x11   :  { %143 = dma.done.wait [#allocation3], 256  }
  0x12   :  { %144 = vsyncadd [#allocation3], 4294967040 }
  0x13   :  { %35 = sfence }
  0x14   :  { %s36_s0 = sld [smem:[#allocation2]]  ;;  %v38_v0 = vld [vmem:[#allocation6] sm:$0xff]  ;;  %v39_v1 = vld [vmem:[#allocation6 + $0x8] sm:$0xff]  ;;  %s149_s1 = smov [#allocation7]  }
  0x15   :  { %s76_s18 = sld [smem:[#allocation2 + $0x1]]  ;;  %s66_s19 = sshll.u32 %s149_s1, 4  ;;  %s67_s19 = int_to_ptr.vmem [resolvable:$true] %s66_s19 }
  0x16   :  { %s121_s20 = scalar_lea.vmem %s67_s19, 256  ;;  %p126_p6 = scmp.lt.s32.totalorder %s67_s19, %s67_s19 }
  0x17   :  { %p122_p5 = scmp.ne.s32.totalorder %s67_s19, %s121_s20  ;;  %p127_p7 = scmp.lt.s32.totalorder %s121_s20, %s121_s20 }
  0x19   :  { %p128_p8 = por %p127_p7, %p126_p6 }
  0x1a   :  { %v40_v2 = vstv %s36_s0 }
  0x1b   :  { %v41_v3 = vmul.f32 %v40_v2, %v38_v0  ;;  %v43_v4 = vstv %s76_s18  ;;  %v42_v5 = vmul.f32 %v40_v2, %v39_v1  ;;  %p129_p9 = pnand %p128_p8, %p122_p5 }
  0x1d   :  { %v44_v6 = vadd.f32 %v43_v4, %v41_v3  ;;  %v45_v7 = vadd.f32 %v43_v4, %v42_v5 }
  0x1f   :  { %v77_v8 = vmul.f32 -1.442695, %v44_v6  ;;  %v78_v9 = vmul.f32 -1.442695, %v45_v7 }
  0x21   :  { %82 = vpow2.f32 %v77_v8 }
  0x22   :  { %84 = vpow2.f32 %v78_v9 }
  0x2e   :  { %v83_v10 = vpop.eup %82 }
  0x2f   :  { %v85_v11 = vpop.eup %84  ;;  %v52_v12 = vadd.f32 1.0, %v83_v10 }
  0x30   :  { %v53_v13 = vadd.f32 1.0, %v85_v11 }
  0x31   :  { %86 = vrcp.f32 %v52_v12 }
  0x32   :  { %88 = vrcp.f32 %v53_v13 }
  0x3e   :  { %v87_v14 = vpop.eup %86 }
  0x3f   :  { %v89_v15 = vpop.eup %88  ;;  %58 = vst [vmem:[#allocation7] sm:$0xff] %v87_v14 }
  0x40   :  { %59 = vst [vmem:[#allocation7 + $0x8] sm:$0xff] %v89_v15 }
  0x41   :  { %132 = shalt.err (!%p129_p9)
}
  0x42   :  { %69 = dma.vmem_to_hbm [thread:$0]  %s67_s19, 256, %s176_s2, [#allocation4]  }
  0x43   :  { %145 = dma.done.wait [#allocation4], 256  }
  0x44   :  { %146 = vsyncadd [#allocation4], 4294967040 }
  0x45   :  { %73 = vsyncpa [#allocation3], 1 }
  0x46   :  { %74 = vsyncpa [#allocation4], 1 }
  0x47   :  { %75 = vsyncpa [#allocation5], 1 }

</bundles_post_ra>
